<compile_context>
chip_gen: v5e
topology: v5e:2x2
jax: 0.10.0
libtpu: 0.0.40
codegen_flags: <defaults>
</compile_context>

<pallas_src>
import functools
import math

import jax
import jax.numpy as jnp
from jax import lax
from jax.experimental import pallas as pl
from jax.experimental.pallas import tpu as pltpu
from jax.scipy.special import erf as jsp_erf

# Set to jnp.bfloat16 on v6e/v7x for ~3x MXU throughput and half the DMA bytes
# (accumulation stays f32).  Default None keeps full-f32 matmuls so the kernel
# tracks the HIGHEST-precision reference tightly.
_MATMUL_DTYPE = None

# Raise the scoped-VMEM allowance so 512-row tiles / resident weights compile on
# v5e (16 MiB default) and v6e/v7x (32 MiB default).  Actual usage stays well below.
_VMEM_LIMIT_BYTES = 64 * 1024 * 1024

_SQRT_2_OVER_PI = 0.7978845608028654


def _mm(x):
    """Optionally cast a matmul operand to the low-precision MXU dtype."""
    return x if _MATMUL_DTYPE is None else x.astype(_MATMUL_DTYPE)


def _gelu_tanh(x):
    # tanh-form GELU: the transcendental goes to the EUP slot instead of ~15 VALU
    # ops per element of the erf polynomial.  |error| vs exact erf-GELU < 1e-3.
    return 0.5 * x * (1.0 + jnp.tanh(_SQRT_2_OVER_PI * (x + 0.044715 * x * x * x)))


def _pick_tile(dim, preferred):
    t = preferred
    while t > 8 and dim % t != 0:
        t //= 2
    return t if dim % t == 0 else dim


def _pick_heads_per_block(num_heads, head_dim):
    # Prefer a head block whose lane width is a multiple of 128 (lane-dense stores,
    # full MXU output columns); otherwise fall back to all heads (block = full H).
    for hpb in range(1, num_heads + 1):
        if num_heads % hpb == 0 and (hpb * head_dim) % 128 == 0:
            return hpb
    return num_heads


# ---------------------------------------------------------------------------
# Kernel 1: fused Q/K/V projection  (PyTorch [out, in] weights, no transposes)
# ---------------------------------------------------------------------------
def _qkv_kernel(x_ref, w_ref, b_ref, o_ref):
    # x_ref: [tm, H]; w_ref: [1, H, H]; b_ref: [1, 1, H]; o_ref: [1, tm, H]
    y = lax.dot_general(_mm(x_ref[...]), _mm(w_ref[0]),
                        dimension_numbers=(((1,), (1,)), ((), ())),
                        preferred_element_type=jnp.float32)
    y = y + b_ref[0].astype(jnp.float32)
    o_ref[0] = y.astype(o_ref.dtype)


def qkv_projection(x, w_qkv, b_qkv, *, tm=512):
    # x: [M, H]; w_qkv: [3, H, H]; b_qkv: [3, 1, H]  ->  [3, M, H]
    M, H = x.shape
    tm = _pick_tile(M, tm)
    return pl.pallas_call(
        _qkv_kernel,
        out_shape=jax.ShapeDtypeStruct((3, M, H), x.dtype),
        grid_spec=pltpu.PrefetchScalarGridSpec(
            num_scalar_prefetch=0,
            grid=(3, M // tm),          # row axis innermost -> weight resident per projection
            in_specs=[
                pl.BlockSpec((tm, H), lambda j, i: (i, 0)),
                pl.BlockSpec((1, H, H), lambda j, i: (j, 0, 0)),   # constant in i
                pl.BlockSpec((1, 1, H), lambda j, i: (j, 0, 0)),
            ],
            out_specs=pl.BlockSpec((1, tm, H), lambda j, i: (j, i, 0)),
        ),
        compiler_params=pltpu.CompilerParams(
            dimension_semantics=("parallel", "parallel"),
            vmem_limit_bytes=_VMEM_LIMIT_BYTES),
    )(x, w_qkv, b_qkv)


# ---------------------------------------------------------------------------
# Kernel 2: attention core, per (batch, head-block), [B, S, H] layout in & out
# ---------------------------------------------------------------------------
def _attention_kernel(qkv_ref, m_ref, o_ref, *, head_dim, heads_per_block, scale):
    # qkv_ref: [3, 1, S, d_blk]; m_ref: [1, 1, 1, S] additive mask; o_ref: [1, S, d_blk]
    q = qkv_ref[0, 0].astype(jnp.float32) * scale   # fold 1/sqrt(dh) into q (S*dh muls, not S*S)
    k = qkv_ref[1, 0].astype(jnp.float32)
    v = qkv_ref[2, 0].astype(jnp.float32)
    m = m_ref[0, 0].astype(jnp.float32)             # [1, S]

    outs = []
    for h in range(heads_per_block):                # static unrolled loop over heads in block
        sl = slice(h * head_dim, (h + 1) * head_dim)
        s = lax.dot_general(_mm(q[:, sl]), _mm(k[:, sl]),
                            dimension_numbers=(((1,), (1,)), ((), ())),
                            preferred_element_type=jnp.float32)      # [S, S]
        s = s + m
        s_max = jnp.max(s, axis=-1, keepdims=True)
        p = jnp.exp(s - s_max)
        denom = jnp.sum(p, axis=-1, keepdims=True)
        p = p * pl.reciprocal(denom, approx=True)                    # EUP slot, frees VALU
        ctx = jnp.dot(_mm(p), _mm(v[:, sl]),
                      preferred_element_type=jnp.float32)            # [S, dh]
        outs.append(ctx)

    blk = outs[0] if heads_per_block == 1 else jnp.concatenate(outs, axis=-1)
    o_ref[0] = blk.astype(o_ref.dtype)


def attention(qkv, mask, *, num_heads, scale):
    # qkv: [3, B, S, H]; mask: [B, 1, 1, S] additive (0 or -10000)  ->  ctx [B, S, H]
    _, B, S, H = qkv.shape
    dh = H // num_heads
    hpb = _pick_heads_per_block(num_heads, dh)
    n_hb = num_heads // hpb
    d_blk = hpb * dh
    kernel = functools.partial(_attention_kernel, head_dim=dh,
                               heads_per_block=hpb, scale=scale)
    return pl.pallas_call(
        kernel,
        out_shape=jax.ShapeDtypeStruct((B, S, H), qkv.dtype),
        grid_spec=pltpu.PrefetchScalarGridSpec(
            num_scalar_prefetch=0,
            grid=(B, n_hb),
            in_specs=[
                pl.BlockSpec((3, 1, S, d_blk), lambda b, hb: (0, b, 0, hb)),
                pl.BlockSpec((1, 1, 1, S), lambda b, hb: (b, 0, 0, 0)),
            ],
            out_specs=pl.BlockSpec((1, S, d_blk), lambda b, hb: (b, 0, hb)),
        ),
        compiler_params=pltpu.CompilerParams(
            dimension_semantics=("parallel", "parallel"),
            vmem_limit_bytes=_VMEM_LIMIT_BYTES),
    )(qkv, mask)


# ---------------------------------------------------------------------------
# Kernel 3: dense + residual + LayerNorm (BertSelfOutput)
# ---------------------------------------------------------------------------
def _dense_residual_ln_kernel(x_ref, w_ref, b_ref, r_ref, g_ref, beta_ref, o_ref, *, eps):
    # x_ref: [tm, K], w_ref: [H, K], b/g/beta: [1, H], r_ref/o_ref: [tm, H]
    y = lax.dot_general(_mm(x_ref[...]), _mm(w_ref[...]),
                        dimension_numbers=(((1,), (1,)), ((), ())),
                        preferred_element_type=jnp.float32)
    y = y + b_ref[...].astype(jnp.float32) + r_ref[...].astype(jnp.float32)
    mean = jnp.mean(y, axis=-1, keepdims=True)
    c = y - mean
    var = jnp.mean(c * c, axis=-1, keepdims=True)
    y = c * lax.rsqrt(var + eps)
    y = y * g_ref[...].astype(jnp.float32) + beta_ref[...].astype(jnp.float32)
    o_ref[...] = y.astype(o_ref.dtype)


def dense_residual_layernorm(x, w, b, residual, gamma, beta, *, eps, tm=512):
    M, K = x.shape
    H = w.shape[0]
    tm = _pick_tile(M, tm)
    kernel = functools.partial(_dense_residual_ln_kernel, eps=eps)
    return pl.pallas_call(
        kernel,
        out_shape=jax.ShapeDtypeStruct((M, H), x.dtype),
        grid_spec=pltpu.PrefetchScalarGridSpec(
            num_scalar_prefetch=0,
            grid=(M // tm,),
            in_specs=[
                pl.BlockSpec((tm, K), lambda i: (i, 0)),
                pl.BlockSpec((H, K), lambda i: (0, 0)),   # weight resident across row tiles
                pl.BlockSpec((1, H), lambda i: (0, 0)),
                pl.BlockSpec((tm, H), lambda i: (i, 0)),
                pl.BlockSpec((1, H), lambda i: (0, 0)),
                pl.BlockSpec((1, H), lambda i: (0, 0)),
            ],
            out_specs=pl.BlockSpec((tm, H), lambda i: (i, 0)),
        ),
        compiler_params=pltpu.CompilerParams(
            dimension_semantics=("parallel",),
            vmem_limit_bytes=_VMEM_LIMIT_BYTES),
    )(x, w, b.reshape(1, H), residual, gamma.reshape(1, H), beta.reshape(1, H))


# ---------------------------------------------------------------------------
# Kernel 4: fused BertIntermediate (dense + GELU) + BertOutput (dense + res + LN)
# ---------------------------------------------------------------------------
def _ffn_kernel(x_ref, w1_ref, b1_ref, w2_ref, b2_ref, g_ref, beta_ref, o_ref,
                acc_ref, *, eps):
    # x_ref: [tm, H] (resident, also the residual); w1_ref: [ti, H]; b1_ref: [1, ti];
    # w2_ref: [H, ti]; b2/g/beta: [1, H]; o_ref: [tm, H]; acc_ref: [tm, H] f32 scratch.
    j = pl.program_id(1)

    @pl.when(j == 0)
    def _():
        acc_ref[...] = jnp.zeros_like(acc_ref)

    h = lax.dot_general(_mm(x_ref[...]), _mm(w1_ref[...]),
                        dimension_numbers=(((1,), (1,)), ((), ())),
                        preferred_element_type=jnp.float32)           # [tm, ti]
    h = _gelu_tanh(h + b1_ref[...].astype(jnp.float32))
    acc_ref[...] += lax.dot_general(_mm(h.astype(w2_ref.dtype)), _mm(w2_ref[...]),
                                    dimension_numbers=(((1,), (1,)), ((), ())),
                                    preferred_element_type=jnp.float32)  # [tm, H]

    @pl.when(j == pl.num_programs(1) - 1)
    def _():
        y = acc_ref[...] + b2_ref[...].astype(jnp.float32) + x_ref[...].astype(jnp.float32)
        mean = jnp.mean(y, axis=-1, keepdims=True)
        c = y - mean
        var = jnp.mean(c * c, axis=-1, keepdims=True)
        y = c * lax.rsqrt(var + eps)
        y = y * g_ref[...].astype(jnp.float32) + beta_ref[...].astype(jnp.float32)
        o_ref[...] = y.astype(o_ref.dtype)


def ffn_fused(x, w1, b1, w2, b2, gamma, beta, *, eps, tm=512, ti=512):
    # x: [M, H]; w1: [I, H]; w2: [H, I]  ->  LayerNorm(gelu(x W1^T + b1) W2^T + b2 + x)
    M, H = x.shape
    I = w1.shape[0]
    tm = _pick_tile(M, tm)
    ti = _pick_tile(I, ti)
    kernel = functools.partial(_ffn_kernel, eps=eps)
    return pl.pallas_call(
        kernel,
        out_shape=jax.ShapeDtypeStruct((M, H), x.dtype),
        grid_spec=pltpu.PrefetchScalarGridSpec(
            num_scalar_prefetch=0,
            grid=(M // tm, I // ti),          # reduction (intermediate) axis last
            in_specs=[
                pl.BlockSpec((tm, H), lambda i, j: (i, 0)),   # resident across reduction
                pl.BlockSpec((ti, H), lambda i, j: (j, 0)),
                pl.BlockSpec((1, ti), lambda i, j: (0, j)),
                pl.BlockSpec((H, ti), lambda i, j: (0, j)),
                pl.BlockSpec((1, H), lambda i, j: (0, 0)),
                pl.BlockSpec((1, H), lambda i, j: (0, 0)),
                pl.BlockSpec((1, H), lambda i, j: (0, 0)),
            ],
            out_specs=pl.BlockSpec((tm, H), lambda i, j: (i, 0)),
            scratch_shapes=[pltpu.VMEM((tm, H), jnp.float32)],
        ),
        compiler_params=pltpu.CompilerParams(
            dimension_semantics=("parallel", "arbitrary"),
            vmem_limit_bytes=_VMEM_LIMIT_BYTES),
    )(x, w1, b1.reshape(1, I), w2, b2.reshape(1, H),
      gamma.reshape(1, H), beta.reshape(1, H))


# ---------------------------------------------------------------------------
# BertLayer forward
# ---------------------------------------------------------------------------
def bert_layer(hidden_states, attention_mask, p, *, num_heads, eps=1e-12):
    """hidden_states: [B, S, H]; attention_mask: [B, 1, 1, S] additive mask."""
    B, S, H = hidden_states.shape
    dh = H // num_heads
    x2d = hidden_states.reshape(B * S, H)

    # Fused Q/K/V projection -> [3, B, S, H]  (reshape is free; no transposes)
    w_qkv = jnp.stack([p["q_w"], p["k_w"], p["v_w"]])                  # [3, H, H]
    b_qkv = jnp.stack([p["q_b"], p["k_b"], p["v_b"]]).reshape(3, 1, H)
    qkv = qkv_projection(x2d, w_qkv, b_qkv).reshape(3, B, S, H)

    # Attention core, result already in [B, S, H] layout
    ctx2d = attention(qkv, attention_mask, num_heads=num_heads,
                      scale=1.0 / math.sqrt(dh)).reshape(B * S, H)

    # BertSelfOutput: dense + residual + LayerNorm
    attn_out = dense_residual_layernorm(ctx2d, p["attn_out_w"], p["attn_out_b"],
                                        x2d, p["ln1_g"], p["ln1_b"], eps=eps)
    # BertIntermediate + BertOutput fused (GELU activation never hits HBM)
    layer_out = ffn_fused(attn_out, p["inter_w"], p["inter_b"],
                          p["out_w"], p["out_b"], p["ln2_g"], p["ln2_b"], eps=eps)
    return layer_out.reshape(B, S, H)


# ---------------------------------------------------------------------------
# Plain-JAX reference (same semantics as the PyTorch forward, eval mode)
# ---------------------------------------------------------------------------
def bert_layer_ref(hidden_states, attention_mask, p, *, num_heads, eps=1e-12):
    B, S, H = hidden_states.shape
    dh = H // num_heads
    hp = lax.Precision.HIGHEST

    def lin(x, w, b):
        return jnp.dot(x, w.T, precision=hp) + b

    def ln(x, g, b):
        mu = jnp.mean(x, axis=-1, keepdims=True)
        var = jnp.mean((x - mu) ** 2, axis=-1, keepdims=True)
        return (x - mu) / jnp.sqrt(var + eps) * g + b

    def heads(t):
        return t.reshape(B, S, num_heads, dh).transpose(0, 2, 1, 3)

    q = heads(lin(hidden_states, p["q_w"], p["q_b"]))
    k = heads(lin(hidden_states, p["k_w"], p["k_b"]))
    v = heads(lin(hidden_states, p["v_w"], p["v_b"]))
    scores = jnp.einsum("bhqd,bhkd->bhqk", q, k, precision=hp) / math.sqrt(dh)
    scores = scores + attention_mask
    probs = jax.nn.softmax(scores, axis=-1)
    ctx = jnp.einsum("bhqk,bhkd->bhqd", probs, v, precision=hp)
    ctx = ctx.transpose(0, 2, 1, 3).reshape(B, S, H)
    attn_out = ln(lin(ctx, p["attn_out_w"], p["attn_out_b"]) + hidden_states,
                  p["ln1_g"], p["ln1_b"])
    inter = lin(attn_out, p["inter_w"], p["inter_b"])
    inter = inter * 0.5 * (1.0 + jsp_erf(inter / jnp.sqrt(2.0)))
    return ln(lin(inter, p["out_w"], p["out_b"]) + attn_out, p["ln2_g"], p["ln2_b"])


if __name__ == "__main__":
    key = jax.random.PRNGKey(0)
    keys = jax.random.split(key, 17)

    B, S, H, num_heads, I = 2, 8, 32, 2, 128
    eps = 1e-12

    hidden_states = jax.random.normal(keys[0], (B, S, H), dtype=jnp.float32)
    lengths = jnp.array([S, 5])
    valid = (jnp.arange(S)[None, :] < lengths[:, None]).astype(jnp.float32)   # [B, S]
    attention_mask = (1.0 - valid)[:, None, None, :] * -10000.0               # [B, 1, 1, S]

    def w_init(k_, shape):
        return 0.02 * jax.random.normal(k_, shape, dtype=jnp.float32)

    params = {
        "q_w": w_init(keys[1], (H, H)),        "q_b": w_init(keys[2], (H,)),
        "k_w": w_init(keys[3], (H, H)),        "k_b": w_init(keys[4], (H,)),
        "v_w": w_init(keys[5], (H, H)),        "v_b": w_init(keys[6], (H,)),
        "attn_out_w": w_init(keys[7], (H, H)), "attn_out_b": w_init(keys[8], (H,)),
        "ln1_g": 1.0 + w_init(keys[9], (H,)),  "ln1_b": w_init(keys[10], (H,)),
        "inter_w": w_init(keys[11], (I, H)),   "inter_b": w_init(keys[12], (I,)),
        "out_w": w_init(keys[13], (H, I)),     "out_b": w_init(keys[14], (H,)),
        "ln2_g": 1.0 + w_init(keys[15], (H,)), "ln2_b": w_init(keys[16], (H,)),
    }

    out = bert_layer(hidden_states, attention_mask, params, num_heads=num_heads, eps=eps)
    out = jax.block_until_ready(out)

    ref = bert_layer_ref(hidden_states, attention_mask, params, num_heads=num_heads, eps=eps)
    assert out.shape == (B, S, H)
    max_diff = jnp.max(jnp.abs(out - ref))
    assert jnp.allclose(out, ref, atol=2e-3, rtol=2e-3), f"mismatch vs reference: {max_diff}"

    print("KERNEL_OK")
</pallas_src>

<mosaic_0001>
module attributes {stable_mosaic.version = 11 : i64} {
  func.func @_qkv_kernel(%arg0: i32, %arg1: i32, %arg2: memref<16x32xf32, #tpu.memory_space<vmem>>, %arg3: memref<1x32x32xf32, #tpu.memory_space<vmem>>, %arg4: memref<1x1x32xf32, #tpu.memory_space<vmem>>, %arg5: memref<1x16x32xf32, #tpu.memory_space<vmem>>) attributes {dimension_semantics = [#tpu.dimension_semantics<parallel>, #tpu.dimension_semantics<parallel>], iteration_bounds = array<i64: 3, 1>, scalar_prefetch = 0 : i64, scratch_operands = 0 : i64, tpu.core_type = #tpu.core_type<tc>, window_params = [{transform_indices = @transform_0, window_bounds = array<i64: 16, 32>}, {transform_indices = @transform_1, window_bounds = array<i64: 1, 32, 32>}, {transform_indices = @transform_2, window_bounds = array<i64: 1, 1, 32>}, {transform_indices = @transform_3, window_bounds = array<i64: 1, 16, 32>}]} {
    %c0 = arith.constant 0 : index
    %c0_0 = arith.constant 0 : index
    %0 = vector.load %arg2[%c0, %c0_0] : memref<16x32xf32, #tpu.memory_space<vmem>>, vector<16x32xf32>
    %c0_1 = arith.constant 0 : index
    %c0_2 = arith.constant 0 : index
    %c0_3 = arith.constant 0 : index
    %1 = vector.load %arg3[%c0_1, %c0_2, %c0_3] : memref<1x32x32xf32, #tpu.memory_space<vmem>>, vector<1x32x32xf32>
    %2 = vector.shape_cast %1 : vector<1x32x32xf32> to vector<32x32xf32>
    %cst = arith.constant dense<0.000000e+00> : vector<16x32xf32>
    %3 = tpu.matmul %0, %2, %cst {dimension_numbers = #tpu.dot_dimension_numbers<[1], [1], [0], [0], [0, 0, 1, 0], [], []>} : vector<16x32xf32>, vector<32x32xf32>, vector<16x32xf32> -> vector<16x32xf32>
    %c0_4 = arith.constant 0 : index
    %c0_5 = arith.constant 0 : index
    %c0_6 = arith.constant 0 : index
    %4 = vector.load %arg4[%c0_4, %c0_5, %c0_6] : memref<1x1x32xf32, #tpu.memory_space<vmem>>, vector<1x1x32xf32>
    %5 = vector.shape_cast %4 : vector<1x1x32xf32> to vector<1x32xf32>
    %6 = vector.broadcast %5 : vector<1x32xf32> to vector<16x32xf32>
    %7 = arith.addf %3, %6 : vector<16x32xf32>
    %c0_7 = arith.constant 0 : index
    %c0_8 = arith.constant 0 : index
    %c0_9 = arith.constant 0 : index
    %8 = vector.load %arg5[%c0_7, %c0_8, %c0_9] : memref<1x16x32xf32, #tpu.memory_space<vmem>>, vector<1x16x32xf32>
    %9 = vector.shape_cast %8 : vector<1x16x32xf32> to vector<16x32xf32>
    %10 = vector.shape_cast %7 : vector<16x32xf32> to vector<1x16x32xf32>
    tpu.vector_store %arg5[%c0_7, %c0_8, %c0_9], %10 {strides = array<i32>} : memref<1x16x32xf32, #tpu.memory_space<vmem>>, vector<1x16x32xf32>,
    return
  }
  func.func @transform_0(%arg0: i32, %arg1: i32) -> (i32, i32) {
    %c0_i32 = arith.constant 0 : i32
    %c0_i32_0 = arith.constant 0 : i32
    return %arg1, %c0_i32 : i32, i32
  }
  func.func @transform_1(%arg0: i32, %arg1: i32) -> (i32, i32, i32) {
    %c0_i32 = arith.constant 0 : i32
    %c0_i32_0 = arith.constant 0 : i32
    %c0_i32_1 = arith.constant 0 : i32
    return %arg0, %c0_i32, %c0_i32_0 : i32, i32, i32
  }
  func.func @transform_2(%arg0: i32, %arg1: i32) -> (i32, i32, i32) {
    %c0_i32 = arith.constant 0 : i32
    %c0_i32_0 = arith.constant 0 : i32
    %c0_i32_1 = arith.constant 0 : i32
    return %arg0, %c0_i32, %c0_i32_0 : i32, i32, i32
  }
  func.func @transform_3(%arg0: i32, %arg1: i32) -> (i32, i32, i32) {
    %c0_i32 = arith.constant 0 : i32
    %c0_i32_0 = arith.constant 0 : i32
    return %arg0, %arg1, %c0_i32 : i32, i32, i32
  }
}

</mosaic_0001>

<bundles_post_ra>
// kernel: tpu_custom_call.1
= control target key start
LH: loop header
LB: loop body
LE: loop exit
PB: predicated region body
PF: predicated region fallthrough
CT: control target
= control target key end

     0   :  { %8 = vsyncpa [#allocation3], 0  ;;  %s953_s0 = inlined_call_operand.hbm [shape: f32[16,32], index: 0, kind: input, shape index: {}]   ;;  %s954_s1 = inlined_call_operand.hbm [shape: f32[3,32,32], index: 1, kind: input, shape index: {}]   ;;  %s955_s2 = inlined_call_operand.hbm [shape: f32[3,1,32], index: 2, kind: input, shape index: {}]   ;;  %s956_s3 = inlined_call_operand.hbm [shape: f32[3,16,32], index: 3, kind: output, shape index: {}]  }
   0x1   :  { %9 = vsyncpa [#allocation6], 0 }
   0x2   :  { %11 = vsyncpa [#allocation6 + $0x1], 0 }
   0x3   :  { %12 = vsyncpa [#allocation4], 0 }
   0x4   :  { %14 = vsyncpa [#allocation4 + $0x1], 0  ;;  %s765_s12 = smov 0   ;;  %s767_s13 = smov 0  }
   0x5   :  { %s769_s14 = smov 0   ;;  %s771_s15 = smov 0  }
   0x6   :  { %s773_s16 = smov 0   ;;  %s775_s17 = smov 0  }
   0x7 LB: > { %s32_s18 = sadd.s32 1, %s734_s16  ;;  %s65_s19 = sadd.s32 1, %s726_s14  ;;  %s738_s17 = sphi %s775_s17, %s20_s17   ;;  %s734_s16 = sphi %s773_s16, %s967_s16   ;;  %s730_s15 = sphi %s771_s15, %s966_s15   ;;  %s726_s14 = sphi %s769_s14, %s965_s14   ;;  %s722_s13 = sphi %s767_s13, %s964_s13   ;;  %s718_s12 = sphi %s765_s12, %s963_s12  }
   0x8   : > { %p34_p0 = scmp.ge.s32.totalorder %s32_s18, 3  ;;  %p72_p1 = scmp.ne.s32.totalorder %s726_s14, %s722_s13 }
   0x9   : > { %p73_p2 = scmp.eq.s32.totalorder %s738_s17, 0  ;;  %p505_p5 = scmp.lt.s32.totalorder %s738_s17, 3 }
   0xa   : > { %s969_s18 = smov (%p34_p0, %s32_s18), 0  ;;  %s173_s22 = sand.u32 1, %s738_s17  }
   0xb   : > { %p805_p3 = por %p73_p2, %p72_p1  ;;  %s62_s21 = ssub.s32 %s734_s16, %s969_s18 }
   0xc   : > { %p63_p4 = scmp.eq.s32.totalorder %s62_s21, 0  ;;  %s175_s23 = sand.u32 1, %s726_s14  }
   0xd   : > { %s455_s25 = sshll.u32 %s175_s23, 5  ;;  %s473_s26 = sshll.u32 %s734_s16, 5 }
   0xe   : > { %s815_s24 = scalar_select %p63_p4, %s726_s14, %s65_s19  }
   0xf   : > { %s182_s29 = scalar_lea.hbm %s954_s1, %s473_s26  ;;  %s177_s30 = scalar_lea.vmem [#allocation5], %s455_s25 }
  0x10   : > { %s185_s4 = sshll.u32 %s177_s30, 4  ;;  %s183_s5 = sshll.u32 %s182_s29, 4  ;;  %s186_s4 = int_to_ptr.vmem [resolvable:$true] %s185_s4  ;;  %s184_s5 = int_to_ptr.hbm [resolvable:$true] %s183_s5 }
  0x11   : > { %p825_p6 = pnand %p505_p5, %p805_p3  ;;  %s829_s7 = scalar_lea.sflag [#allocation6], %s173_s22 }
  0x12   : > { %s740_s8 = smov 128   ;;  %s741_s9 = smov 8  }
  0x13   : > { %496 = dma.hbm_to_vmem [thread:$0]  (!%p825_p6), %s184_s5, 512, %s186_s4, %s829_s7, %s740_s8, %s740_s8, %s741_s9  }
  0x14   : > { %s838_s10 = sadd.s32 4294967295, %s738_s17   ;;  %s451_s11 = sadd.s32 4294967294, %s738_s17  }
  0x15   : > { %p78_p7 = scmp.ne.s32.totalorder %s722_s13, %s718_s12  ;;  %p79_p8 = scmp.eq.s32.totalorder %s838_s10, 0 }
  0x16   : > { %p130_p9 = scmp.eq.s32.totalorder %s838_s10, 2  ;;  %p136_p10 = scmp.eq.s32.totalorder %s451_s11, 2 }
  0x17   : > { %p452_p11 = scmp.ge.s32.totalorder %s738_s17, 1  ;;  %p848_p12 = por %p79_p8, %p78_p7 }
  0x18   : > { %p855_p13 = por %p130_p9, %p72_p1  ;;  %p859_p0 = por %p136_p10, %p78_p7 }
  0x19   : > { %p143_p2 = scmp.lt.s32.totalorder %s738_s17, 4  ;;  %s157_s26 = sshll.u32 %s953_s0, 4  ;;  %s158_s26 = int_to_ptr.hbm [resolvable:$true] %s157_s26 }
  0x1a   : > { %s742_s28 = smov [#allocation2]   ;;  %s201_s5 = scalar_lea.hbm %s955_s2, %s734_s16 }
  0x1b   : > { %p867_p3 = pnand %p452_p11, %p143_p2  ;;  %s159_s29 = sshll.u32 %s742_s28, 4  ;;  %s160_s29 = int_to_ptr.vmem [resolvable:$true] %s159_s29 }
  0x1c   : > { %s203_s11 = sshll.u32 %s201_s5, 4  ;;  %s198_s22 = scalar_lea.vmem [#allocation7], %s175_s23  ;;  %s204_s11 = int_to_ptr.hbm [resolvable:$true] %s203_s11 }
  0x1d   : > { %p489_p1 = pneg %p867_p3  ;;  %s205_s25 = sshll.u32 %s198_s22, 4  ;;  %s206_s25 = int_to_ptr.vmem [resolvable:$true] %s205_s25 }
  0x1e   : > { %499 = dma.hbm_to_vmem [thread:$0]  (!%p825_p6), %s204_s11, 16, %s206_s25, %s829_s7  }
  0x1f   : > { %p490_p4 = pnand %p489_p1, %p79_p8  ;;  %214 = sbr.rel (%p867_p3) target bundleno = 190 (0xbe), region = 32 }
  0x21   : > { %492 = dma.hbm_to_vmem [thread:$0]  (!%p490_p4), %s158_s26, 256, %s160_s29, [#allocation3], %s740_s8, %s740_s8, %s741_s9  }
  0x24   : > { %705 = dma.done.wait (%p79_p8), [#allocation3], 256  }
  0x25   : > { %707 = vsyncadd (%p79_p8), [#allocation3], 4294967040  ;;  %s221_s23 = sand.u32 1, %s838_s10   ;;  %s895_s28 = sand.u32 1, %s722_s13  }
  0x26   : > { %s460_s30 = sshll.u32 %s895_s28, 5  ;;  %s222_s8 = scalar_lea.sflag [#allocation6], %s221_s23 }
  0x27   : > { %s225_s6 = scalar_lea.vmem [#allocation5], %s460_s30 }
  0x28   : > { %709 = dma.done.wait (%p848_p12), %s222_s8, 528  }
  0x29   : > { %711 = vsyncadd (%p848_p12), %s222_s8, 4294966768  ;;  %vm274_vm0 = vcmask 261120   ;;  %v269_v0 = vld [vmem:[%s225_s6 + $0x18] sm:$0xff]  ;;  %v268_v1 = vld [vmem:[%s225_s6 + $0x10] sm:$0xff]  ;;  %s234_s7 = scalar_lea.vmem [#allocation7], %s895_s28  ;;  %s461_s9 = sshll.u32 %s895_s28, 4 }
  0x2a   : > { %462 = vmatpush.xpose.msk.msra.mxu0 %vm274_vm0, %v269_v0  ;;  %475 = vmatpush.xpose.msk.msra.mxu1 %vm274_vm0, %v269_v0  ;;  %v267_v2 = vld [vmem:[%s225_s6 + $0x8] sm:$0xff]  ;;  %v266_v3 = vld [vmem:[%s225_s6] sm:$0xff]  ;;  %v264_v4 = vld [vmem:[#allocation2] sm:$0xff]  ;;  %s474_s10 = sshll.u32 %s730_s15, 4  ;;  %s261_s29 = scalar_lea.vmem [#allocation8], %s461_s9 }
  0x2b   : > { %v265_v5 = vld [vmem:[#allocation2 + $0x8] sm:$0xff]  ;;  %s332_s27 = scalar_lea.hbm %s956_s3, %s474_s10  ;;  %v561_v6 = vld [vmem:[%s234_s7] ss:$0 sm:$0xff]  ;;  %s333_s4 = sshll.u32 %s261_s29, 4  ;;  %s334_s4 = int_to_ptr.vmem [resolvable:$true] %s333_s4 }
  0x2c   : > { %s335_s5 = sshll.u32 %s332_s27, 4  ;;  %s319_s15 = scalar_lea.sflag [#allocation4], %s895_s28  ;;  %s336_s5 = int_to_ptr.hbm [resolvable:$true] %s335_s5 }
  0x2d   : > { %s666_s11 = sshra.s32 %s336_s5, 4  ;;  %s672_s30 = scalar_lea.hbm %s956_s3, 48  ;;  %s667_s11 = int_to_ptr.hbm [resolvable:$true] %s666_s11 }
  0x2e   : > { %463 = vmatpush.xpose.msk.msra.mxu0 %vm274_vm0, %v268_v1  ;;  %476 = vmatpush.xpose.msk.msra.mxu1 %vm274_vm0, %v268_v1  ;;  %s668_s22 = scalar_lea.hbm %s667_s11, 16  ;;  %p673_p8 = scmp.lt.s32.totalorder %s667_s11, %s956_s3 }
  0x2f   : > { %p669_p5 = scmp.ne.s32.totalorder %s667_s11, %s668_s22  ;;  %p674_p9 = scmp.lt.s32.totalorder %s672_s30, %s668_s22 }
  0x31   : > { %p670_p6 = pnand %p669_p5, %p855_p13  ;;  %p675_p10 = por %p674_p9, %p673_p8 }
  0x32   : > { %464 = vmatpush.xpose.msk.msra.mxu0 %vm274_vm0, %v267_v2  ;;  %477 = vmatpush.xpose.msk.msra.mxu1 %vm274_vm0, %v267_v2 }
  0x33   : > { %p671_p7 = pneg %p670_p6 }
  0x35   : > { %p676_p11 = pnand %p675_p10, %p671_p7 }
  0x36   : > { %465 = vmatpush.xpose.msk.msra.mxu0 %vm274_vm0, %v266_v3  ;;  %478 = vmatpush.xpose.msk.msra.mxu1 %vm274_vm0, %v266_v3 }
  0x39   : > { %466 = vmatmul.msk.f32.vlgmr.msra.gmra.mxu0 %vm274_vm0, %v264_v4  ;;  %467 = vmatmul.msk.f32.vlgmr.msra.gmra.mxu1 %vm274_vm0, %v265_v5 }
  0xb6   : > { %v310_v7 = vpop.f32.mrf.mxu0  ;;  %v313_v8 = vpop.f32.mrf.mxu1 }
  0xb7   : > { %v311_v9 = vadd.f32 %v561_v6, %v310_v7  ;;  %v314_v10 = vadd.f32 %v561_v6, %v313_v8 }
  0xb9   : > { %316 = vst.msk [vmem:[%s261_s29] sm:$0xff] %vm274_vm0, %v311_v9 }
  0xba   : > { %317 = vst.msk [vmem:[%s261_s29 + $0x8] sm:$0xff] %vm274_vm0, %v314_v10 }
  0xbb   : > { %679 = shalt.err (!%p676_p11)
}
  0xbc   : > { %s743_s28 = smov 128   ;;  %s744_s7 = smov 8  }
  0xbd   : > { %487 = dma.vmem_to_hbm [thread:$0]  (%p855_p13), %s334_s4, 256, %s336_s5, %s319_s15, %s743_s28, %s743_s28, %s744_s7  }
  0xbe PF: > { %p507_p12 = scmp.ge.s32.totalorder %s738_s17, 2  ;;  %s350_s9 = sand.u32 1, %s718_s12  }
  0xbf   : > { %s351_s10 = scalar_lea.sflag [#allocation4], %s350_s9 }
  0xc0   : > { %p501_p2 = pnand %p507_p12, %p859_p0 }
  0xc2   : > { %p502_p3 = pneg %p501_p2 }
  0xc4   : > { %713 = dma.done.wait (%p502_p3), %s351_s10, 256  }
  0xc5   : > { %715 = vsyncadd (%p502_p3), %s351_s10, 4294967040  ;;  %s20_s17 = sadd.s32 1, %s738_s17   ;;  %s963_s12 = smov %s722_s13 }
  0xc6   : > { %p17_p1 = scmp.ge.s32.totalorder %s20_s17, 5   ;;  %s964_s13 = smov %s726_s14 }
  0xc7   : > { %s965_s14 = smov %s815_s24  ;;  %s966_s15 = smov %s734_s16 }
  0xc8   : > { %s967_s16 = smov %s969_s18  ;;  %19 = sbr.rel (!%p17_p1) target bundleno = 7 (0x7), region = 94 }
  0xcd   :  { %357 = vsyncpa [#allocation3], 1 }
  0xce   :  { %359 = vsyncpa [#allocation3 + $0x1], 1 }
  0xcf   :  { %360 = vsyncpa [#allocation6], 1 }
  0xd0   :  { %362 = vsyncpa [#allocation6 + $0x1], 1 }
  0xd1   :  { %363 = vsyncpa [#allocation4], 1 }
  0xd2   :  { %365 = vsyncpa [#allocation4 + $0x1], 1 }

</bundles_post_ra>
